<compile_context>
chip_gen: v5e
topology: v5e:2x2
jax: 0.10.0
libtpu: 0.0.40
codegen_flags: <defaults>
</compile_context>

<pallas_src>
import jax
import jax.numpy as jnp
from jax import lax
from jax.experimental import pallas as pl
from jax.experimental.pallas import tpu as pltpu

# Make the pure-JAX reference use full-f32 matmuls so the correctness check is tight.
jax.config.update("jax_default_matmul_precision", "highest")


# ---------------------------------------------------------------------------
# Fused encoder kernel (embedding + L-layer LSTM over the whole sequence)
# ---------------------------------------------------------------------------
def _make_encoder_kernel(*, n_layers, hid_dim, seq_len, batch):
    def kernel(src_ref, emb_ref, *refs):
        # refs layout: [wcat_0, b_0, ..., wcat_{L-1}, b_{L-1},
        #               outputs_ref, hidden_ref, cell_ref, h_scratch, c_scratch]
        w_refs = refs[: 2 * n_layers]
        out_ref, hid_ref, cell_ref, h_sc, c_sc = refs[2 * n_layers:]

        # Zero initial (h0, c0) -- nn.LSTM default when no state is passed.
        h_sc[...] = jnp.zeros_like(h_sc)
        c_sc[...] = jnp.zeros_like(c_sc)

        def step(t, carry):
            # ---- in-kernel embedding gather -------------------------------
            # token ids are scalars in SMEM; embedding table is VMEM-resident.
            # One dynamic-sublane row load per batch element.
            rows = [emb_ref[pl.ds(src_ref[t, b], 1), :] for b in range(batch)]
            x = jnp.concatenate(rows, axis=0)              # [B, E]
            # dropout(embedded) is identity in eval mode.

            # ---- stacked LSTM cell, one step ------------------------------
            for l in range(n_layers):
                w_cat = w_refs[2 * l][...]                 # [(In_l + H), 4H]
                bias = w_refs[2 * l + 1][...]              # [1, 4H]  (b_ih + b_hh)
                h_prev = h_sc[l]                           # [B, H]
                c_prev = c_sc[l]                           # [B, H]

                # Single fused gate matmul: [x, h] @ [W_ih^T ; W_hh^T] + b
                gates = jnp.dot(
                    jnp.concatenate([x, h_prev], axis=-1), w_cat,
                    preferred_element_type=jnp.float32) + bias   # [B, 4H]

                # Two full-width transcendental passes over the (B, 4H) tile,
                # then cheap slices for the i/f/g/o gates (PyTorch gate order).
                sg = jax.nn.sigmoid(gates)
                tg = jnp.tanh(gates)
                i_g = sg[:, 0 * hid_dim:1 * hid_dim]
                f_g = sg[:, 1 * hid_dim:2 * hid_dim]
                g_g = tg[:, 2 * hid_dim:3 * hid_dim]
                o_g = sg[:, 3 * hid_dim:4 * hid_dim]

                c_new = f_g * c_prev + i_g * g_g
                h_new = o_g * jnp.tanh(c_new)

                h_sc[l] = h_new
                c_sc[l] = c_new
                x = h_new      # inter-layer dropout of nn.LSTM = identity in eval

            out_ref[t] = x     # top-layer hidden state for this timestep
            return carry

        lax.fori_loop(0, seq_len, step, 0)

        # Final per-layer states written straight to the [L, B, H] outputs.
        hid_ref[...] = h_sc[...]
        cell_ref[...] = c_sc[...]

    return kernel


# ---------------------------------------------------------------------------
# Wrapper: single fused pallas_call for the whole forward pass
# ---------------------------------------------------------------------------
def encoder_forward(params, src):
    seq_len, batch = src.shape
    emb = params["embedding"]
    lstm = params["lstm"]
    n_layers = len(lstm)
    hid_dim = lstm[0][0].shape[1] // 4

    flat_weights = []
    for w_cat, b in lstm:
        flat_weights.extend([w_cat, b])

    kernel = _make_encoder_kernel(
        n_layers=n_layers, hid_dim=hid_dim, seq_len=seq_len, batch=batch)

    smem = pl.BlockSpec(memory_space=pltpu.MemorySpace.SMEM)
    vmem = pl.BlockSpec(memory_space=pltpu.MemorySpace.VMEM)

    outputs, hidden, cell = pl.pallas_call(
        kernel,
        out_shape=(
            jax.ShapeDtypeStruct((seq_len, batch, hid_dim), jnp.float32),
            jax.ShapeDtypeStruct((n_layers, batch, hid_dim), jnp.float32),
            jax.ShapeDtypeStruct((n_layers, batch, hid_dim), jnp.float32),
        ),
        in_specs=[smem, vmem] + [vmem] * (2 * n_layers),
        out_specs=(vmem, vmem, vmem),
        scratch_shapes=[
            pltpu.VMEM((n_layers, batch, hid_dim), jnp.float32),  # h state
            pltpu.VMEM((n_layers, batch, hid_dim), jnp.float32),  # c state
        ],
    )(src, emb, *flat_weights)
    return outputs, hidden, cell


# ---------------------------------------------------------------------------
# Pure-JAX reference (PyTorch nn.LSTM semantics) for the correctness check
# ---------------------------------------------------------------------------
def encoder_reference(params, src):
    seq_len, batch = src.shape
    lstm = params["lstm"]
    n_layers = len(lstm)
    hid_dim = lstm[0][0].shape[1] // 4

    x_seq = params["embedding"][src]                      # [T, B, E]
    h = jnp.zeros((n_layers, batch, hid_dim), jnp.float32)
    c = jnp.zeros((n_layers, batch, hid_dim), jnp.float32)
    outs = []
    for t in range(seq_len):
        x = x_seq[t]
        new_h, new_c = [], []
        for l, (w_cat, b) in enumerate(lstm):
            gates = jnp.concatenate([x, h[l]], axis=-1) @ w_cat + b
            i = jax.nn.sigmoid(gates[:, :hid_dim])
            f = jax.nn.sigmoid(gates[:, hid_dim:2 * hid_dim])
            g = jnp.tanh(gates[:, 2 * hid_dim:3 * hid_dim])
            o = jax.nn.sigmoid(gates[:, 3 * hid_dim:])
            c_new = f * c[l] + i * g
            h_new = o * jnp.tanh(c_new)
            new_h.append(h_new)
            new_c.append(c_new)
            x = h_new
        h = jnp.stack(new_h)
        c = jnp.stack(new_c)
        outs.append(x)
    return jnp.stack(outs), h, c


# ---------------------------------------------------------------------------
# Deterministic parameter construction (shapes from Encoder.__init__)
# ---------------------------------------------------------------------------
def make_params(key, input_dim, emb_dim, hid_dim, n_layers):
    keys = jax.random.split(key, 1 + 4 * n_layers)
    it = iter(keys)
    params = {"embedding": 0.1 * jax.random.normal(next(it), (input_dim, emb_dim),
                                                   jnp.float32)}
    lstm = []
    for l in range(n_layers):
        in_dim = emb_dim if l == 0 else hid_dim
        w_ih = 0.1 * jax.random.normal(next(it), (4 * hid_dim, in_dim), jnp.float32)
        w_hh = 0.1 * jax.random.normal(next(it), (4 * hid_dim, hid_dim), jnp.float32)
        b_ih = 0.1 * jax.random.normal(next(it), (4 * hid_dim,), jnp.float32)
        b_hh = 0.1 * jax.random.normal(next(it), (4 * hid_dim,), jnp.float32)
        # Pre-transpose and pre-concatenate: one fused gate matmul per layer per step.
        w_cat = jnp.concatenate([w_ih.T, w_hh.T], axis=0)          # [(In+H), 4H]
        b = (b_ih + b_hh).reshape(1, 4 * hid_dim)                  # [1, 4H]
        lstm.append((w_cat, b))
    params["lstm"] = lstm
    return params


if __name__ == "__main__":
    INPUT_DIM = 16    # vocab size
    EMB_DIM = 32
    HID_DIM = 32      # 4*H = 128 -> gates fill one full vreg lane row
    N_LAYERS = 2
    SEQ_LEN = 8
    BATCH = 8         # fills the 8-sublane vreg dimension

    root = jax.random.PRNGKey(0)
    k_par, k_src = jax.random.split(root)

    params = make_params(k_par, INPUT_DIM, EMB_DIM, HID_DIM, N_LAYERS)
    src = jax.random.randint(k_src, (SEQ_LEN, BATCH), 0, INPUT_DIM, jnp.int32)

    outputs, hidden, cell = encoder_forward(params, src)
    jax.block_until_ready((outputs, hidden, cell))

    out_ref, h_ref, c_ref = encoder_reference(params, src)

    assert outputs.shape == (SEQ_LEN, BATCH, HID_DIM)
    assert hidden.shape == (N_LAYERS, BATCH, HID_DIM)
    assert cell.shape == (N_LAYERS, BATCH, HID_DIM)
    assert jnp.allclose(outputs, out_ref, atol=1e-4, rtol=1e-4)
    assert jnp.allclose(hidden, h_ref, atol=1e-4, rtol=1e-4)
    assert jnp.allclose(cell, c_ref, atol=1e-4, rtol=1e-4)

    print("KERNEL_OK")
</pallas_src>

<mosaic_0001>
module attributes {stable_mosaic.version = 11 : i64} {
  func.func @kernel(%arg0: memref<8x8xi32, #tpu.memory_space<smem>>, %arg1: memref<16x32xf32, #tpu.memory_space<vmem>>, %arg2: memref<64x128xf32, #tpu.memory_space<vmem>>, %arg3: memref<1x128xf32, #tpu.memory_space<vmem>>, %arg4: memref<64x128xf32, #tpu.memory_space<vmem>>, %arg5: memref<1x128xf32, #tpu.memory_space<vmem>>, %arg6: memref<8x8x32xf32, #tpu.memory_space<vmem>>, %arg7: memref<2x8x32xf32, #tpu.memory_space<vmem>>, %arg8: memref<2x8x32xf32, #tpu.memory_space<vmem>>, %arg9: memref<2x8x32xf32, #tpu.memory_space<vmem>>, %arg10: memref<2x8x32xf32, #tpu.memory_space<vmem>>) attributes {dimension_semantics = [], scalar_prefetch = 0 : i64, scratch_operands = 2 : i64, tpu.core_type = #tpu.core_type<tc>} {
    %cst = arith.constant 0.000000e+00 : f32
    %0 = vector.broadcast %cst : f32 to vector<2x8x32xf32>
    %c0 = arith.constant 0 : index
    %c0_0 = arith.constant 0 : index
    %c0_1 = arith.constant 0 : index
    %1 = vector.load %arg9[%c0, %c0_0, %c0_1] : memref<2x8x32xf32, #tpu.memory_space<vmem>>, vector<2x8x32xf32>
    tpu.vector_store %arg9[%c0, %c0_0, %c0_1], %0 {strides = array<i32>} : memref<2x8x32xf32, #tpu.memory_space<vmem>>, vector<2x8x32xf32>,
    %cst_2 = arith.constant 0.000000e+00 : f32
    %2 = vector.broadcast %cst_2 : f32 to vector<2x8x32xf32>
    %c0_3 = arith.constant 0 : index
    %c0_4 = arith.constant 0 : index
    %c0_5 = arith.constant 0 : index
    %3 = vector.load %arg10[%c0_3, %c0_4, %c0_5] : memref<2x8x32xf32, #tpu.memory_space<vmem>>, vector<2x8x32xf32>
    tpu.vector_store %arg10[%c0_3, %c0_4, %c0_5], %2 {strides = array<i32>} : memref<2x8x32xf32, #tpu.memory_space<vmem>>, vector<2x8x32xf32>,
    %c0_i32 = arith.constant 0 : i32
    %c8_i32 = arith.constant 8 : i32
    %4 = arith.addi %c0_i32, %c8_i32 : i32
    %c1_i32 = arith.constant 1 : i32
    scf.for %arg11 = %c0_i32 to %4 step %c1_i32  : i32 {
      %9 = arith.index_cast %arg11 : i32 to index
      %c0_19 = arith.constant 0 : index
      %10 = memref.load %arg0[%9, %c0_19] : memref<8x8xi32, #tpu.memory_space<smem>>
      %11 = arith.index_cast %10 : i32 to index
      %c0_20 = arith.constant 0 : index
      %12 = vector.load %arg1[%11, %c0_20] : memref<16x32xf32, #tpu.memory_space<vmem>>, vector<1x32xf32>
      %13 = arith.index_cast %arg11 : i32 to index
      %c1 = arith.constant 1 : index
      %14 = memref.load %arg0[%13, %c1] : memref<8x8xi32, #tpu.memory_space<smem>>
      %15 = arith.index_cast %14 : i32 to index
      %c0_21 = arith.constant 0 : index
      %16 = vector.load %arg1[%15, %c0_21] : memref<16x32xf32, #tpu.memory_space<vmem>>, vector<1x32xf32>
      %17 = arith.index_cast %arg11 : i32 to index
      %c2 = arith.constant 2 : index
      %18 = memref.load %arg0[%17, %c2] : memref<8x8xi32, #tpu.memory_space<smem>>
      %19 = arith.index_cast %18 : i32 to index
      %c0_22 = arith.constant 0 : index
      %20 = vector.load %arg1[%19, %c0_22] : memref<16x32xf32, #tpu.memory_space<vmem>>, vector<1x32xf32>
      %21 = arith.index_cast %arg11 : i32 to index
      %c3 = arith.constant 3 : index
      %22 = memref.load %arg0[%21, %c3] : memref<8x8xi32, #tpu.memory_space<smem>>
      %23 = arith.index_cast %22 : i32 to index
      %c0_23 = arith.constant 0 : index
      %24 = vector.load %arg1[%23, %c0_23] : memref<16x32xf32, #tpu.memory_space<vmem>>, vector<1x32xf32>
      %25 = arith.index_cast %arg11 : i32 to index
      %c4 = arith.constant 4 : index
      %26 = memref.load %arg0[%25, %c4] : memref<8x8xi32, #tpu.memory_space<smem>>
      %27 = arith.index_cast %26 : i32 to index
      %c0_24 = arith.constant 0 : index
      %28 = vector.load %arg1[%27, %c0_24] : memref<16x32xf32, #tpu.memory_space<vmem>>, vector<1x32xf32>
      %29 = arith.index_cast %arg11 : i32 to index
      %c5 = arith.constant 5 : index
      %30 = memref.load %arg0[%29, %c5] : memref<8x8xi32, #tpu.memory_space<smem>>
      %31 = arith.index_cast %30 : i32 to index
      %c0_25 = arith.constant 0 : index
      %32 = vector.load %arg1[%31, %c0_25] : memref<16x32xf32, #tpu.memory_space<vmem>>, vector<1x32xf32>
      %33 = arith.index_cast %arg11 : i32 to index
      %c6 = arith.constant 6 : index
      %34 = memref.load %arg0[%33, %c6] : memref<8x8xi32, #tpu.memory_space<smem>>
      %35 = arith.index_cast %34 : i32 to index
      %c0_26 = arith.constant 0 : index
      %36 = vector.load %arg1[%35, %c0_26] : memref<16x32xf32, #tpu.memory_space<vmem>>, vector<1x32xf32>
      %37 = arith.index_cast %arg11 : i32 to index
      %c7 = arith.constant 7 : index
      %38 = memref.load %arg0[%37, %c7] : memref<8x8xi32, #tpu.memory_space<smem>>
      %39 = arith.index_cast %38 : i32 to index
      %c0_27 = arith.constant 0 : index
      %40 = vector.load %arg1[%39, %c0_27] : memref<16x32xf32, #tpu.memory_space<vmem>>, vector<1x32xf32>
      %41 = tpu.concatenate %12, %16, %20, %24, %28, %32, %36, %40 in 0 : vector<1x32xf32>, vector<1x32xf32>, vector<1x32xf32>, vector<1x32xf32>, vector<1x32xf32>, vector<1x32xf32>, vector<1x32xf32>, vector<1x32xf32> -> vector<8x32xf32>
      %c0_28 = arith.constant 0 : index
      %c0_29 = arith.constant 0 : index
      %42 = vector.load %arg2[%c0_28, %c0_29] : memref<64x128xf32, #tpu.memory_space<vmem>>, vector<64x128xf32>
      %c0_30 = arith.constant 0 : index
      %c0_31 = arith.constant 0 : index
      %43 = vector.load %arg3[%c0_30, %c0_31] : memref<1x128xf32, #tpu.memory_space<vmem>>, vector<1x128xf32>
      %c0_32 = arith.constant 0 : index
      %c0_33 = arith.constant 0 : index
      %c0_34 = arith.constant 0 : index
      %44 = vector.load %arg9[%c0_32, %c0_33, %c0_34] : memref<2x8x32xf32, #tpu.memory_space<vmem>>, vector<1x8x32xf32>
      %45 = vector.shape_cast %44 : vector<1x8x32xf32> to vector<8x32xf32>
      %c0_35 = arith.constant 0 : index
      %c0_36 = arith.constant 0 : index
      %c0_37 = arith.constant 0 : index
      %46 = vector.load %arg10[%c0_35, %c0_36, %c0_37] : memref<2x8x32xf32, #tpu.memory_space<vmem>>, vector<1x8x32xf32>
      %47 = vector.shape_cast %46 : vector<1x8x32xf32> to vector<8x32xf32>
      %48 = tpu.concatenate %41, %45 in 1 : vector<8x32xf32>, vector<8x32xf32> -> vector<8x64xf32>
      %cst_38 = arith.constant dense<0.000000e+00> : vector<8x128xf32>
      %49 = tpu.matmul %48, %42, %cst_38 {dimension_numbers = #tpu.dot_dimension_numbers<[1], [0], [0], [1], [0, 0, 1, 1], [], []>, precision = #tpu.contract_precision<fp32>} : vector<8x64xf32>, vector<64x128xf32>, vector<8x128xf32> -> vector<8x128xf32>
      %50 = vector.broadcast %43 : vector<1x128xf32> to vector<8x128xf32>
      %51 = arith.addf %49, %50 : vector<8x128xf32>
      %52 = arith.negf %51 : vector<8x128xf32>
      %53 = math.exp %52 : vector<8x128xf32>
      %cst_39 = arith.constant 1.000000e+00 : f32
      %54 = vector.broadcast %cst_39 : f32 to vector<8x128xf32>
      %55 = arith.addf %54, %53 : vector<8x128xf32>
      %56 = arith.divf %54, %55 : vector<8x128xf32>
      %57 = math.tanh %51 : vector<8x128xf32>
      %58 = vector.extract_strided_slice %56 {offsets = [0, 0], sizes = [8, 32], strides = [1, 1]} : vector<8x128xf32> to vector<8x32xf32>
      %59 = vector.extract_strided_slice %56 {offsets = [0, 32], sizes = [8, 32], strides = [1, 1]} : vector<8x128xf32> to vector<8x32xf32>
      %60 = vector.extract_strided_slice %57 {offsets = [0, 64], sizes = [8, 32], strides = [1, 1]} : vector<8x128xf32> to vector<8x32xf32>
      %61 = vector.extract_strided_slice %56 {offsets = [0, 96], sizes = [8, 32], strides = [1, 1]} : vector<8x128xf32> to vector<8x32xf32>
      %62 = arith.mulf %59, %47 : vector<8x32xf32>
      %63 = arith.mulf %58, %60 : vector<8x32xf32>
      %64 = arith.addf %62, %63 : vector<8x32xf32>
      %65 = math.tanh %64 : vector<8x32xf32>
      %66 = arith.mulf %61, %65 : vector<8x32xf32>
      %c0_40 = arith.constant 0 : index
      %c0_41 = arith.constant 0 : index
      %c0_42 = arith.constant 0 : index
      %67 = vector.load %arg9[%c0_40, %c0_41, %c0_42] : memref<2x8x32xf32, #tpu.memory_space<vmem>>, vector<1x8x32xf32>
      %68 = vector.shape_cast %67 : vector<1x8x32xf32> to vector<8x32xf32>
      %69 = vector.shape_cast %66 : vector<8x32xf32> to vector<1x8x32xf32>
      tpu.vector_store %arg9[%c0_40, %c0_41, %c0_42], %69 {strides = array<i32>} : memref<2x8x32xf32, #tpu.memory_space<vmem>>, vector<1x8x32xf32>,
      %c0_43 = arith.constant 0 : index
      %c0_44 = arith.constant 0 : index
      %c0_45 = arith.constant 0 : index
      %70 = vector.load %arg10[%c0_43, %c0_44, %c0_45] : memref<2x8x32xf32, #tpu.memory_space<vmem>>, vector<1x8x32xf32>
      %71 = vector.shape_cast %70 : vector<1x8x32xf32> to vector<8x32xf32>
      %72 = vector.shape_cast %64 : vector<8x32xf32> to vector<1x8x32xf32>
      tpu.vector_store %arg10[%c0_43, %c0_44, %c0_45], %72 {strides = array<i32>} : memref<2x8x32xf32, #tpu.memory_space<vmem>>, vector<1x8x32xf32>,
      %c0_46 = arith.constant 0 : index
      %c0_47 = arith.constant 0 : index
      %73 = vector.load %arg4[%c0_46, %c0_47] : memref<64x128xf32, #tpu.memory_space<vmem>>, vector<64x128xf32>
      %c0_48 = arith.constant 0 : index
      %c0_49 = arith.constant 0 : index
      %74 = vector.load %arg5[%c0_48, %c0_49] : memref<1x128xf32, #tpu.memory_space<vmem>>, vector<1x128xf32>
      %c1_50 = arith.constant 1 : index
      %c0_51 = arith.constant 0 : index
      %c0_52 = arith.constant 0 : index
      %75 = vector.load %arg9[%c1_50, %c0_51, %c0_52] : memref<2x8x32xf32, #tpu.memory_space<vmem>>, vector<1x8x32xf32>
      %76 = vector.shape_cast %75 : vector<1x8x32xf32> to vector<8x32xf32>
      %c1_53 = arith.constant 1 : index
      %c0_54 = arith.constant 0 : index
      %c0_55 = arith.constant 0 : index
      %77 = vector.load %arg10[%c1_53, %c0_54, %c0_55] : memref<2x8x32xf32, #tpu.memory_space<vmem>>, vector<1x8x32xf32>
      %78 = vector.shape_cast %77 : vector<1x8x32xf32> to vector<8x32xf32>
      %79 = tpu.concatenate %66, %76 in 1 : vector<8x32xf32>, vector<8x32xf32> -> vector<8x64xf32>
      %cst_56 = arith.constant dense<0.000000e+00> : vector<8x128xf32>
      %80 = tpu.matmul %79, %73, %cst_56 {dimension_numbers = #tpu.dot_dimension_numbers<[1], [0], [0], [1], [0, 0, 1, 1], [], []>, precision = #tpu.contract_precision<fp32>} : vector<8x64xf32>, vector<64x128xf32>, vector<8x128xf32> -> vector<8x128xf32>
      %81 = vector.broadcast %74 : vector<1x128xf32> to vector<8x128xf32>
      %82 = arith.addf %80, %81 : vector<8x128xf32>
      %83 = arith.negf %82 : vector<8x128xf32>
      %84 = math.exp %83 : vector<8x128xf32>
      %cst_57 = arith.constant 1.000000e+00 : f32
      %85 = vector.broadcast %cst_57 : f32 to vector<8x128xf32>
      %86 = arith.addf %85, %84 : vector<8x128xf32>
      %87 = arith.divf %85, %86 : vector<8x128xf32>
      %88 = math.tanh %82 : vector<8x128xf32>
      %89 = vector.extract_strided_slice %87 {offsets = [0, 0], sizes = [8, 32], strides = [1, 1]} : vector<8x128xf32> to vector<8x32xf32>
      %90 = vector.extract_strided_slice %87 {offsets = [0, 32], sizes = [8, 32], strides = [1, 1]} : vector<8x128xf32> to vector<8x32xf32>
      %91 = vector.extract_strided_slice %88 {offsets = [0, 64], sizes = [8, 32], strides = [1, 1]} : vector<8x128xf32> to vector<8x32xf32>
      %92 = vector.extract_strided_slice %87 {offsets = [0, 96], sizes = [8, 32], strides = [1, 1]} : vector<8x128xf32> to vector<8x32xf32>
      %93 = arith.mulf %90, %78 : vector<8x32xf32>
      %94 = arith.mulf %89, %91 : vector<8x32xf32>
      %95 = arith.addf %93, %94 : vector<8x32xf32>
      %96 = math.tanh %95 : vector<8x32xf32>
      %97 = arith.mulf %92, %96 : vector<8x32xf32>
      %c1_58 = arith.constant 1 : index
      %c0_59 = arith.constant 0 : index
      %c0_60 = arith.constant 0 : index
      %98 = vector.load %arg9[%c1_58, %c0_59, %c0_60] : memref<2x8x32xf32, #tpu.memory_space<vmem>>, vector<1x8x32xf32>
      %99 = vector.shape_cast %98 : vector<1x8x32xf32> to vector<8x32xf32>
      %100 = vector.shape_cast %97 : vector<8x32xf32> to vector<1x8x32xf32>
      tpu.vector_store %arg9[%c1_58, %c0_59, %c0_60], %100 {strides = array<i32>} : memref<2x8x32xf32, #tpu.memory_space<vmem>>, vector<1x8x32xf32>,
      %c1_61 = arith.constant 1 : index
      %c0_62 = arith.constant 0 : index
      %c0_63 = arith.constant 0 : index
      %101 = vector.load %arg10[%c1_61, %c0_62, %c0_63] : memref<2x8x32xf32, #tpu.memory_space<vmem>>, vector<1x8x32xf32>
      %102 = vector.shape_cast %101 : vector<1x8x32xf32> to vector<8x32xf32>
      %103 = vector.shape_cast %95 : vector<8x32xf32> to vector<1x8x32xf32>
      tpu.vector_store %arg10[%c1_61, %c0_62, %c0_63], %103 {strides = array<i32>} : memref<2x8x32xf32, #tpu.memory_space<vmem>>, vector<1x8x32xf32>,
      %104 = arith.index_cast %arg11 : i32 to index
      %c0_64 = arith.constant 0 : index
      %c0_65 = arith.constant 0 : index
      %105 = vector.load %arg6[%104, %c0_64, %c0_65] : memref<8x8x32xf32, #tpu.memory_space<vmem>>, vector<1x8x32xf32>
      %106 = vector.shape_cast %105 : vector<1x8x32xf32> to vector<8x32xf32>
      %107 = vector.shape_cast %97 : vector<8x32xf32> to vector<1x8x32xf32>
      tpu.vector_store %arg6[%104, %c0_64, %c0_65], %107 {strides = array<i32>} : memref<8x8x32xf32, #tpu.memory_space<vmem>>, vector<1x8x32xf32>,
    }
    %c8_i32_6 = arith.constant 8 : i32
    %c0_7 = arith.constant 0 : index
    %c0_8 = arith.constant 0 : index
    %c0_9 = arith.constant 0 : index
    %5 = vector.load %arg9[%c0_7, %c0_8, %c0_9] : memref<2x8x32xf32, #tpu.memory_space<vmem>>, vector<2x8x32xf32>
    %c0_10 = arith.constant 0 : index
    %c0_11 = arith.constant 0 : index
    %c0_12 = arith.constant 0 : index
    %6 = vector.load %arg7[%c0_10, %c0_11, %c0_12] : memref<2x8x32xf32, #tpu.memory_space<vmem>>, vector<2x8x32xf32>
    tpu.vector_store %arg7[%c0_10, %c0_11, %c0_12], %5 {strides = array<i32>} : memref<2x8x32xf32, #tpu.memory_space<vmem>>, vector<2x8x32xf32>,
    %c0_13 = arith.constant 0 : index
    %c0_14 = arith.constant 0 : index
    %c0_15 = arith.constant 0 : index
    %7 = vector.load %arg10[%c0_13, %c0_14, %c0_15] : memref<2x8x32xf32, #tpu.memory_space<vmem>>, vector<2x8x32xf32>
    %c0_16 = arith.constant 0 : index
    %c0_17 = arith.constant 0 : index
    %c0_18 = arith.constant 0 : index
    %8 = vector.load %arg8[%c0_16, %c0_17, %c0_18] : memref<2x8x32xf32, #tpu.memory_space<vmem>>, vector<2x8x32xf32>
    tpu.vector_store %arg8[%c0_16, %c0_17, %c0_18], %7 {strides = array<i32>} : memref<2x8x32xf32, #tpu.memory_space<vmem>>, vector<2x8x32xf32>,
    return
  }
}

</mosaic_0001>

<bundles_post_ra>
// kernel: tpu_custom_call.1
= control target key start
LH: loop header
LB: loop body
LE: loop exit
PB: predicated region body
PF: predicated region fallthrough
CT: control target
= control target key end

     0   :  { %14 = vsyncpa [#allocation7], 0  ;;  %s1392_s0 = inlined_call_operand.hbm [shape: s32[8,8], index: 0, kind: input, shape index: {}]   ;;  %s1393_s1 = inlined_call_operand.hbm [shape: f32[16,32], index: 1, kind: input, shape index: {}]   ;;  %s1394_s2 = inlined_call_operand.hbm [shape: f32[64,128], index: 2, kind: input, shape index: {}]   ;;  %s1395_s3 = inlined_call_operand.vmem [shape: f32[1,128], index: 3, kind: input, shape index: {}]   ;;  %s1396_s4 = inlined_call_operand.hbm [shape: f32[64,128], index: 4, kind: input, shape index: {}]   ;;  %s1397_s5 = inlined_call_operand.vmem [shape: f32[1,128], index: 5, kind: input, shape index: {}]   ;;  %s1398_s6 = inlined_call_operand.hbm [shape: f32[8,8,32], index: 6, kind: output, shape index: {0}]   ;;  %s1399_s7 = inlined_call_operand.hbm [shape: f32[2,8,32], index: 7, kind: output, shape index: {1}]   ;;  %s1400_s8 = inlined_call_operand.hbm [shape: f32[2,8,32], index: 8, kind: output, shape index: {2}]  }
   0x1   :  { %15 = vsyncpa [#allocation5], 0 }
   0x2   :  { %16 = vsyncpa [#allocation10], 0 }
   0x3   :  { %17 = vsyncpa [#allocation6], 0 }
   0x4   :  { %18 = vsyncpa [#allocation14], 0  ;;  %s45_s29 = sshll.u32 %s1394_s2, 4  ;;  %s1088_s30 = smov [#allocation9]   ;;  %s46_s29 = int_to_ptr.hbm [resolvable:$true] %s45_s29 }
   0x5   :  { %s47_s9 = sshll.u32 %s1088_s30, 4  ;;  %s24_s12 = sshll.u32 %s1392_s0, 4  ;;  %s48_s9 = int_to_ptr.vmem [resolvable:$true] %s47_s9  ;;  %s25_s12 = int_to_ptr.hbm [resolvable:$true] %s24_s12 }
   0x6   :  { %s1089_s13 = smov 128   ;;  %s1090_s14 = smov 8  }
   0x7   :  { %53 = dma.hbm_to_vmem [thread:$0]  %s46_s29, 1024, %s48_s9, [#allocation10], %s1089_s13, %s1089_s13, %s1090_s14  }
   0x8   :  { %s1091_s15 = smov [#allocation4]   ;;  %s32_s2 = sshll.u32 %s1393_s1, 4  ;;  %s33_s2 = int_to_ptr.hbm [resolvable:$true] %s32_s2 }
   0x9   :  { %27 = dma.hbm_to_smem %s25_s12, 128, %s1091_s15, [#allocation7]  }
   0xa   :  { %s1092_s18 = smov [#allocation8]   ;;  %s60_s0 = sshll.u32 %s1396_s4, 4  ;;  %s61_s0 = int_to_ptr.hbm [resolvable:$true] %s60_s0 }
   0xb   :  { %s34_s19 = sshll.u32 %s1092_s18, 4  ;;  %s1093_s22 = smov [#allocation11]   ;;  %s35_s19 = int_to_ptr.vmem [resolvable:$true] %s34_s19 }
   0xc   :  { %40 = dma.hbm_to_vmem [thread:$0]  %s33_s2, 256, %s35_s19, [#allocation5], %s1089_s13, %s1089_s13, %s1090_s14  }
   0xd   :  { %s62_s23 = sshll.u32 %s1093_s22, 4  ;;  %s63_s23 = int_to_ptr.vmem [resolvable:$true] %s62_s23 }
   0xe   :  { %68 = dma.hbm_to_vmem [thread:$0]  %s61_s0, 1024, %s63_s23, [#allocation10], %s1089_s13, %s1089_s13, %s1090_s14  }
   0xf   :  { %1074 = dma.done.wait [#allocation7], 128  }
  0x10   :  { %1075 = vsyncadd [#allocation7], 4294967168 }
  0x11   :  { %1076 = dma.done.wait [#allocation5], 256  }
  0x12   :  { %1077 = vsyncadd [#allocation5], 4294967040 }
  0x13   :  { %1078 = dma.done.wait [#allocation10], 2048  }
  0x14   :  { %1079 = vsyncadd [#allocation10], 4294965248 }
  0x15   :  { %87 = sfence }
  0x16   :  { %vm88_vm0 = vcmask 261120   ;;  %v1094_v0 = vmov 0.0   ;;  %s1171_s1 = smov 0  }
  0x17   :  { %89 = vst.msk [vmem:[#allocation2] sm:$0xff] %vm88_vm0, %v1094_v0 }
  0x18   :  { %90 = vst.msk [vmem:[#allocation2 + $0x8] sm:$0xff] %vm88_vm0, %v1094_v0 }
  0x19   :  { %91 = vst.msk [vmem:[#allocation3] sm:$0xff] %vm88_vm0, %v1094_v0 }
  0x1a   :  { %92 = vst.msk [vmem:[#allocation3 + $0x8] sm:$0xff] %vm88_vm0, %v1094_v0 }
  0x1b LB: > { %v173_v2 = vld [vmem:[#allocation9 + $0x38] sm:$0xff]  ;;  %v172_v3 = vld [vmem:[#allocation9 + $0x30] sm:$0xff]  ;;  %s1095_s4 = smov 32   ;;  %v171_v6 = vld [vmem:[#allocation9 + $0x28] sm:$0xff]  ;;  %s871_s24 = sshll.u32 %s1086_s1, 7  ;;  %vm152_vm1 = vcmask 1040384   ;;  %s1086_s1 = sphi %s1171_s1, %s98_s1  }
  0x1c   : > { %v1177_v4 = vand.u32 4294901760, %v173_v2  ;;  %v1179_v5 = vand.u32 4294901760, %v172_v3  ;;  %v170_v7 = vld [vmem:[#allocation9 + $0x20] sm:$0xff]  ;;  %v169_v8 = vld [vmem:[#allocation9 + $0x18] sm:$0xff]  ;;  %v1181_v9 = vand.u32 4294901760, %v171_v6  ;;  %v168_v12 = vld [vmem:[#allocation9 + $0x10] sm:$0xff] }
  0x1d   : > { %v1183_v10 = vand.u32 4294901760, %v170_v7  ;;  %v1185_v11 = vand.u32 4294901760, %v169_v8  ;;  %v167_v13 = vld [vmem:[#allocation9 + $0x8] sm:$0xff]  ;;  %v166_v14 = vld [vmem:[#allocation9] sm:$0xff]  ;;  %v1194_v17 = vand.u32 4294901760, %v168_v12  ;;  %s103_s25 = sadd.s32 1, %s871_s24 }
  0x1e   : > { %v175_v1 = vld [vmem:[#allocation2] sm:$0xff]  ;;  %v1188_v15 = vsub.f32 %v173_v2, %v1177_v4  ;;  %v1191_v16 = vsub.f32 %v172_v3, %v1179_v5  ;;  %198 = vmatpush.msra.mxu0 %v1177_v4  ;;  %330 = vmatpush.msra.mxu3 %v1177_v4  ;;  %v1197_v18 = vand.u32 4294901760, %v167_v13  ;;  %v243_v19 = vsub.f32 %v171_v6, %v1181_v9  ;;  %s104_s26 = sld [smem:[#allocation4 + %s103_s25]]  ;;  %s107_s27 = sadd.s32 2, %s871_s24 }
  0x1f   : > { %178 = vrot.lane.b32.xlu0 %v175_v1, %s1095_s4  ;;  %v1201_v20 = vsub.f32 %v170_v7, %v1183_v10  ;;  %v1204_v21 = vsub.f32 %v169_v8, %v1185_v11  ;;  %v1206_v22 = vand.u32 4294901760, %v166_v14  ;;  %v261_v25 = vsub.f32 %v168_v12, %v1194_v17  ;;  %s108_s28 = sld [smem:[#allocation4 + %s107_s27]]  ;;  %s111_s29 = sadd.s32 3, %s871_s24 }
  0x20   : > { %v232_v23 = vand.u32 4294901760, %v1188_v15  ;;  %v238_v24 = vand.u32 4294901760, %v1191_v16  ;;  %293 = vmatpush.msra.mxu2 %v1188_v15  ;;  %200 = vmatpush.msra.mxu0 %v1179_v5  ;;  %v244_v26 = vand.u32 4294901760, %v243_v19  ;;  %v267_v31 = vsub.f32 %v167_v13, %v1197_v18  ;;  %s100_s30 = sld [smem:[#allocation4 + %s871_s24]]  ;;  %s115_s10 = sadd.s32 4, %s871_s24  ;;  %v176_v2 = vld [vmem:[#allocation3] sm:$0xff] }
  0x21   : > { %v250_v27 = vand.u32 4294901760, %v1201_v20  ;;  %332 = vmatpush.msra.mxu3 %v1179_v5  ;;  %v256_v30 = vand.u32 4294901760, %v1204_v21  ;;  %v273_v33 = vsub.f32 %v166_v14, %v1206_v22  ;;  %v262_v37 = vand.u32 4294901760, %v261_v25  ;;  %s112_s9 = sld [smem:[#allocation4 + %s111_s29]]  ;;  %s119_s11 = sadd.s32 5, %s871_s24  ;;  %447 = vrot.lane.b32.xlu1 %v176_v2, %s1095_s4 }
  0x22   : > { %v233_v28 = vsub.f32 %v1188_v15, %v232_v23  ;;  %v239_v29 = vsub.f32 %v1191_v16, %v238_v24  ;;  %296 = vmatpush.msra.mxu2 %v1191_v16  ;;  %202 = vmatpush.msra.mxu0 %v1181_v9  ;;  %v245_v32 = vsub.f32 %v243_v19, %v244_v26  ;;  %v268_v40 = vand.u32 4294901760, %v267_v31  ;;  %s116_s12 = sld [smem:[#allocation4 + %s115_s10]]  ;;  %s123_s17 = sadd.s32 6, %s871_s24 }
  0x23   : > { %334 = vmatpush.msra.mxu3 %v1181_v9  ;;  %v251_v36 = vsub.f32 %v1201_v20, %v250_v27  ;;  %v257_v39 = vsub.f32 %v1204_v21, %v256_v30  ;;  %v263_v42 = vsub.f32 %v261_v25, %v262_v37  ;;  %v274_v43 = vand.u32 4294901760, %v273_v33  ;;  %s120_s16 = sld [smem:[#allocation4 + %s119_s11]]  ;;  %s127_s20 = sadd.s32 7, %s871_s24 }
  0x24   : > { %v234_v34 = vand.u32 4294901760, %v233_v28  ;;  %v240_v35 = vand.u32 4294901760, %v239_v29  ;;  %299 = vmatpush.msra.mxu2 %v243_v19  ;;  %204 = vmatpush.msra.mxu0 %v1183_v10  ;;  %v246_v38 = vand.u32 4294901760, %v245_v32  ;;  %v269_v45 = vsub.f32 %v267_v31, %v268_v40  ;;  %s105_s15 = scalar_lea.vmem [#allocation8], %s104_s26  ;;  %s124_s19 = sld [smem:[#allocation4 + %s123_s17]] }
  0x25   : > { %336 = vmatpush.msra.mxu3 %v1183_v10  ;;  %v252_v41 = vand.u32 4294901760, %v251_v36  ;;  %v258_v44 = vand.u32 4294901760, %v257_v39  ;;  %v264_v46 = vand.u32 4294901760, %v263_v42  ;;  %v275_v47 = vsub.f32 %v273_v33, %v274_v43  ;;  %v106_v50 = vld [vmem:[%s105_s15] sm:$0x1]  ;;  %s109_s2 = scalar_lea.vmem [#allocation8], %s108_s28 }
  0x26   : > { %235 = vmatpush.msra.mxu1 %v234_v34  ;;  %302 = vmatpush.msra.mxu2 %v1201_v20  ;;  %v270_v48 = vand.u32 4294901760, %v269_v45  ;;  %v110_v51 = vld [vmem:[%s109_s2] sm:$0x1]  ;;  %v132_v52 = vrot.slane %v106_v50, 7  ;;  %s101_s18 = scalar_lea.vmem [#allocation8], %s100_s30  ;;  %s128_s0 = sld [smem:[#allocation4 + %s127_s20]] }
  0x27   : > { %206 = vmatpush.msra.mxu0 %v1185_v11  ;;  %338 = vmatpush.msra.mxu3 %v1185_v11  ;;  %v276_v49 = vand.u32 4294901760, %v275_v47  ;;  %v102_v53 = vld [vmem:[%s101_s18] sm:$0x1]  ;;  %s113_s21 = scalar_lea.vmem [#allocation8], %s112_s9  ;;  %v135_v55 = vrot.slane %v110_v51, 6  ;;  %vm154_vm2 = vcmask 1041408  }
  0x28   : > { %241 = vmatpush.msra.mxu1 %v240_v35  ;;  %305 = vmatpush.msra.mxu2 %v1204_v21  ;;  %v114_v54 = vld [vmem:[%s113_s21] sm:$0x1]  ;;  %v153_v56 = vsel %vm152_vm1, %v102_v53, %v132_v52  ;;  %s117_s22 = scalar_lea.vmem [#allocation8], %s116_s12  ;;  %vm156_vm3 = vcmask 1042432   ;;  %vm158_vm4 = vcmask 1043456   ;;  %vm160_vm5 = vcmask 1044480  }
  0x29   : > { %208 = vmatpush.msra.mxu0 %v1194_v17  ;;  %340 = vmatpush.msra.mxu3 %v1194_v17  ;;  %v118_v57 = vld [vmem:[%s117_s22] sm:$0x1]  ;;  %v138_v58 = vrot.slane %v114_v54, 5  ;;  %v155_v59 = vsel %vm154_vm2, %v153_v56, %v135_v55  ;;  %s121_s23 = scalar_lea.vmem [#allocation8], %s120_s16  ;;  %vm162_vm6 = vcmask 1045504   ;;  %vm164_vm7 = vcmask 1046528  }
  0x2a   : > { %247 = vmatpush.msra.mxu1 %v246_v38  ;;  %308 = vmatpush.msra.mxu2 %v261_v25  ;;  %v122_v60 = vld [vmem:[%s121_s23] sm:$0x1]  ;;  %v141_v61 = vrot.slane %v118_v57, 4  ;;  %s125_s25 = scalar_lea.vmem [#allocation8], %s124_s19  ;;  %vm185_vm8 = vcmask 523264   ;;  %s1096_s28 = smov 64  }
  0x2b   : > { %210 = vmatpush.msra.mxu0 %v1197_v18  ;;  %342 = vmatpush.msra.mxu3 %v1197_v18  ;;  %v157_v62 = vsel %vm156_vm3, %v155_v59, %v138_v58  ;;  %v126_v63 = vld [vmem:[%s125_s25] sm:$0x1]  ;;  %v144_v0 = vrot.slane %v122_v60, 3  ;;  %v484_v52 = vld [vmem:[#allocation11 + $0x38] sm:$0xff]  ;;  %v482_v54 = vld [vmem:[#allocation11 + $0x28] sm:$0xff]  ;;  %s1097_s29 = smov 96  }
  0x2c   : > { %253 = vmatpush.msra.mxu1 %v252_v41  ;;  %311 = vmatpush.msra.mxu2 %v267_v31  ;;  %v159_v1 = vsel %vm158_vm4, %v157_v62, %v141_v61  ;;  %s129_s24 = scalar_lea.vmem [#allocation8], %s128_s0  ;;  %v483_v53 = vld [vmem:[#allocation11 + $0x30] sm:$0xff]  ;;  %v1263_v55 = vand.u32 4294901760, %v484_v52  ;;  %v1267_v57 = vand.u32 4294901760, %v482_v54  ;;  %v481_v58 = vld [vmem:[#allocation11 + $0x20] sm:$0xff]  ;;  %v480_v59 = vld [vmem:[#allocation11 + $0x18] sm:$0xff] }
  0x2d   : > { %212 = vmatpush.msra.mxu0 %v1206_v22  ;;  %344 = vmatpush.msra.mxu3 %v1206_v22  ;;  %v130_v3 = vld [vmem:[%s129_s24] sm:$0x1]  ;;  %v1265_v56 = vand.u32 4294901760, %v483_v53  ;;  %v1269_v61 = vand.u32 4294901760, %v481_v58  ;;  %v1271_v62 = vand.u32 4294901760, %v480_v59  ;;  %s874_s10 = sshll.u32 %s1086_s1, 3 }
  0x2e   : > { %259 = vmatpush.msra.mxu1 %v258_v44  ;;  %314 = vmatpush.msra.mxu2 %v273_v33  ;;  %v150_v6 = vrot.slane %v130_v3, 1  ;;  %v479_v60 = vld [vmem:[#allocation11 + $0x10] sm:$0xff]  ;;  %v1276_v2 = vsub.f32 %v484_v52, %v1263_v55  ;;  %s790_s11 = scalar_lea.vmem [#allocation12], %s874_s10  ;;  %s98_s1 = sadd.s32 1, %s1086_s1  }
  0x2f   : > { %363 = vmatpush.msrb.mxu0 %v232_v23  ;;  %v1279_v3 = vsub.f32 %v483_v53, %v1265_v56  ;;  %p95_p0 = scmp.ge.s32.totalorder %s98_s1, 8  }
  0x30   : > { %265 = vmatpush.msra.mxu1 %v264_v46  ;;  %v487_v46 = vld [vmem:[#allocation2 + $0x8] sm:$0xff]  ;;  %510 = vmatpush.msrb.mxu2 %v1263_v55  ;;  %s819_s15 = sshll.u32 (%p95_p0), %s1399_s7, 4  ;;  %s1098_s16 = smov (%p95_p0), [#allocation13]   ;;  %s820_s15 = int_to_ptr.hbm [resolvable:$true] %s819_s15 }
  0x31   : > { %367 = vmatpush.msrb.mxu0 %v238_v24  ;;  %s817_s17 = sshll.u32 (%p95_p0), %s1098_s16, 4  ;;  %s806_s2 = sshll.u32 (%p95_p0), %s1398_s6, 4  ;;  %s818_s17 = int_to_ptr.vmem [resolvable:$true] %s817_s17  ;;  %s807_s2 = int_to_ptr.hbm [resolvable:$true] %s806_s2 }
  0x32   : > { %271 = vmatpush.msra.mxu1 %v270_v48  ;;  %512 = vmatpush.msrb.mxu2 %v1265_v56  ;;  %s832_s20 = sshll.u32 (%p95_p0), %s1400_s8, 4  ;;  %s1100_s21 = smov (%p95_p0), [#allocation15]   ;;  %s833_s20 = int_to_ptr.hbm [resolvable:$true] %s832_s20 }
  0x33   : > { %371 = vmatpush.msrb.mxu0 %v244_v26  ;;  %s830_s0 = sshll.u32 (%p95_p0), %s1100_s21, 4  ;;  %s831_s0 = int_to_ptr.vmem [resolvable:$true] %s830_s0 }
  0x34   : > { %277 = vmatpush.msra.mxu1 %v276_v49  ;;  %514 = vmatpush.msrb.mxu2 %v1267_v57 }
  0x35   : > { %375 = vmatpush.msrb.mxu0 %v250_v27 }
  0x36   : > { %406 = vmatpush.msrb.mxu1 %v1177_v4  ;;  %v147_v4 = vrot.slane %v126_v63, 2  ;;  %v1273_v63 = vand.u32 4294901760, %v479_v60  ;;  %516 = vmatpush.msrb.mxu2 %v1269_v61 }
  0x37   : > { %379 = vmatpush.msrb.mxu0 %v256_v30 }
  0x38   : > { %408 = vmatpush.msrb.mxu1 %v1179_v5  ;;  %v161_v5 = vsel %vm160_vm5, %v159_v1, %v144_v0  ;;  %v478_v0 = vld [vmem:[#allocation11 + $0x8] sm:$0xff]  ;;  %v477_v1 = vld [vmem:[#allocation11] sm:$0xff]  ;;  %518 = vmatpush.msrb.mxu2 %v1271_v62 }
  0x39   : > { %383 = vmatpush.msrb.mxu0 %v262_v37  ;;  %v163_v7 = vsel %vm162_vm6, %v161_v5, %v147_v4  ;;  %v1282_v4 = vsub.f32 %v482_v54, %v1267_v57  ;;  %v1286_v5 = vand.u32 4294901760, %v478_v0 }
  0x3a   : > { %410 = vmatpush.msrb.mxu1 %v1181_v9  ;;  %v165_v8 = vsel %vm164_vm7, %v163_v7, %v150_v6  ;;  %v1289_v6 = vsub.f32 %v481_v58, %v1269_v61  ;;  %v1292_v7 = vsub.f32 %v480_v59, %v1271_v62  ;;  %520 = vmatpush.msrb.mxu2 %v1273_v63 }
  0x3b   : > { %387 = vmatpush.msrb.mxu0 %v268_v40 }
  0x3c   : > { %412 = vmatpush.msrb.mxu1 %v1183_v10  ;;  %522 = vmatpush.msrb.mxu2 %v1286_v5 }
  0x3d   : > { %391 = vmatpush.msrb.mxu0 %v274_v43 }
  0x3e   : > { %414 = vmatpush.msrb.mxu1 %v1185_v11 }
  0x40   : > { %416 = vmatpush.msrb.mxu1 %v1194_v17  ;;  %v896_v17 = vld [vmem:[%s1395_s3] ss:$0 sm:$0xff]  ;;  %s1099_s3 = smov (%p95_p0), [#allocation12]  }
  0x42   : > { %418 = vmatpush.msrb.mxu1 %v1197_v18 }
  0x44   : > { %420 = vmatpush.msrb.mxu1 %v1206_v22 }
  0x91   : > { %v179_v9 = vpop.permute.xlu0 %178 }
  0x92   : > { %v181_v10 = vsel %vm88_vm0, %v165_v8, %v179_v9  ;;  %v1295_v8 = vsub.f32 %v479_v60, %v1273_v63  ;;  %v544_v9 = vand.u32 4294901760, %v1276_v2 }
  0x93   : > { %v187_v11 = vsel %vm185_vm8, %v181_v10, 0  ;;  %v448_v47 = vpop.permute.xlu1 %447  ;;  %v550_v10 = vand.u32 4294901760, %v1279_v3 }
  0x94   : > { %v213_v12 = vand.u32 4294901760, %v187_v11 }
  0x96   : > { %v214_v13 = vsub.f32 %v187_v11, %v213_v12  ;;  %279 = vmatmul.f32.vlgmr.msra.gmra.mxu1 %v213_v12  ;;  %v556_v11 = vand.u32 4294901760, %v1282_v4 }
  0x97   : > { %642 = vmatpush.msra.mxu1 %v1263_v55 }
  0x98   : > { %317 = vmatmul.f32.vlgmr.msra.gmra.mxu2 %v214_v13  ;;  %v215_v14 = vand.u32 4294901760, %v214_v13 }
  0x99   : > { %644 = vmatpush.msra.mxu1 %v1265_v56 }
  0x9a   : > { %348 = vmatmul.f32.vlgmr.msra.gmra.mxu3 %v215_v14  ;;  %v216_v15 = vsub.f32 %v214_v13, %v215_v14  ;;  %v562_v13 = vand.u32 4294901760, %v1289_v6  ;;  %v1306_v14 = vsub.f32 %v478_v0, %v1286_v5 }
  0x9b   : > { %646 = vmatpush.msra.mxu1 %v1267_v57 }
  0x9c   : > { %v217_v16 = vand.u32 4294901760, %v216_v15  ;;  %v545_v15 = vsub.f32 %v1276_v2, %v544_v9 }
  0x9d   : > { %648 = vmatpush.msra.mxu1 %v1269_v61 }
  0x9e   : > { %218 = vmatmul.f32.vlgmr.msra.gmra.mxu0 %v217_v16  ;;  %422 = vmatmul.f32.vlgmr.msrb.gmra.mxu1 %v213_v12  ;;  %v551_v16 = vsub.f32 %v1279_v3, %v550_v10 }
  0x9f   : > { %605 = vmatpush.msra.mxu0 %v1276_v2  ;;  %650 = vmatpush.msra.mxu1 %v1271_v62 }
  0xa1   : > { %608 = vmatpush.msra.mxu0 %v1279_v3  ;;  %652 = vmatpush.msra.mxu1 %v1273_v63 }
  0xa3   : > { %611 = vmatpush.msra.mxu0 %v1282_v4  ;;  %654 = vmatpush.msra.mxu1 %v1286_v5 }
  0xa5   : > { %614 = vmatpush.msra.mxu0 %v1289_v6 }
  0xa6   : > { %393 = vmatmul.f32.vlgmr.msrb.gmra.mxu0 %v213_v12  ;;  %v1302_v12 = vand.u32 4294901760, %v477_v1 }
  0xa7   : > { %617 = vmatpush.msra.mxu0 %v1292_v7 }
  0xa8   : > { %524 = vmatpush.msrb.mxu2 %v1302_v12  ;;  %656 = vmatpush.msra.mxu1 %v1302_v12 }
  0xa9   : > { %620 = vmatpush.msra.mxu0 %v1295_v8 }
  0xaa   : > { %675 = vmatpush.msra.mxu2 %v544_v9 }
  0xab   : > { %623 = vmatpush.msra.mxu0 %v1306_v14 }
  0xac   : > { %679 = vmatpush.msra.mxu2 %v550_v10 }
  0xae   : > { %683 = vmatpush.msra.mxu2 %v556_v11 }
  0xb0   : > { %687 = vmatpush.msra.mxu2 %v562_v13 }
 0x113   : > { %v280_v18 = vpop.f32.mrf.mxu1 }
 0x11b   : > { %v219_v19 = vpop.f32.mrf.mxu0  ;;  %v318_v22 = vpop.f32.mrf.mxu2 }
 0x11c   : > { %v220_v20 = vadd.f32 %v896_v17, %v219_v19  ;;  %v423_v28 = vpop.f32.mrf.mxu1  ;;  %v557_v17 = vsub.f32 %v1282_v4, %v556_v11  ;;  %v574_v19 = vand.u32 4294901760, %v1295_v8 }
 0x11d   : > { %v349_v24 = vpop.f32.mrf.mxu3 }
 0x11e   : > { %v281_v21 = vadd.f32 %v280_v18, %v220_v20  ;;  %v568_v18 = vand.u32 4294901760, %v1292_v7  ;;  %v546_v20 = vand.u32 4294901760, %v545_v15 }
 0x120   : > { %v319_v23 = vadd.f32 %v318_v22, %v281_v21  ;;  %v552_v21 = vand.u32 4294901760, %v551_v16  ;;  %v563_v22 = vsub.f32 %v1289_v6, %v562_v13  ;;  %547 = vmatpush.msrb.mxu3 %v546_v20  ;;  %691 = vmatpush.msra.mxu2 %v568_v18 }
 0x122   : > { %v350_v25 = vadd.f32 %v349_v24, %v319_v23  ;;  %v585_v23 = vsub.f32 %v477_v1, %v1302_v12  ;;  %v558_v24 = vand.u32 4294901760, %v557_v17  ;;  %553 = vmatpush.msrb.mxu3 %v552_v21  ;;  %695 = vmatpush.msra.mxu2 %v574_v19 }
 0x123   : > { %v394_v26 = vpop.f32.mrf.mxu0 }
 0x124   : > { %v395_v27 = vadd.f32 %v394_v26, %v350_v25  ;;  %v569_v25 = vsub.f32 %v1292_v7, %v568_v18  ;;  %v580_v26 = vand.u32 4294901760, %v1306_v14  ;;  %559 = vmatpush.msrb.mxu3 %v558_v24  ;;  %626 = vmatpush.msra.mxu0 %v585_v23 }
 0x126   : > { %v424_v29 = vadd.f32 %v423_v28, %v395_v27  ;;  %v564_v28 = vand.u32 4294901760, %v563_v22  ;;  %699 = vmatpush.msra.mxu2 %v580_v26 }
 0x128   : > { %898 = vtanh.f32 %v424_v29  ;;  %v872_v31 = vmul.f32 -1.442695, %v424_v29  ;;  %v575_v29 = vsub.f32 %v1295_v8, %v574_v19  ;;  %565 = vmatpush.msrb.mxu3 %v564_v28 }
 0x12a   : > { %900 = vpow2.f32 %v872_v31 }
 0x12e   : > { %v899_v30 = vpop.eup %898 }
 0x12f   : > { %452 = vrot.lane.b32.xlu0 %v899_v30, %s1096_s28  ;;  %v586_v30 = vand.u32 4294901760, %v585_v23 }
 0x130   : > { %v901_v32 = vpop.eup %900 }
 0x131   : > { %v429_v33 = vadd.f32 1.0, %v901_v32  ;;  %v570_v32 = vand.u32 4294901760, %v569_v25  ;;  %703 = vmatpush.msra.mxu2 %v586_v30 }
 0x133   : > { %902 = vrcp.f32 %v429_v33  ;;  %v441_v39 = vand.u32 2147483648, %v429_v33  ;;  %vm435_vm10 = vweird.f32 %v429_v33  ;;  %v439_v40 = vand.u32 2147483647, %v429_v33  ;;  %571 = vmatpush.msrb.mxu3 %v570_v32 }
 0x135   : > { %v442_v42 = vor.u32 1.1754944e-38, %v441_v39  ;;  %vm440_vm12 = vcmp.eq.f32.partialorder %v439_v40, 8.507059e+37 }
 0x137   : > { %491 = vrot.lane.b32.xlu0 %v487_v46, %s1095_s4 }
 0x139   : > { %v903_v34 = vpop.eup %902 }
 0x13a   : > { %v431_v35 = vmul.f32 %v903_v34, %v429_v33  ;;  %vm436_vm9 = vweird.f32 %v903_v34  ;;  %v581_v33 = vsub.f32 %v1306_v14, %v580_v26 }
 0x13b   : > { %vm437_vm11 = vmor %vm435_vm10, %vm436_vm9 }
 0x13c   : > { %v432_v36 = vsub.f32 1.0, %v431_v35  ;;  %v587_v35 = vsub.f32 %v585_v23, %v586_v30 }
 0x13e   : > { %v433_v37 = vmul.f32 %v903_v34, %v432_v36  ;;  %v582_v36 = vand.u32 4294901760, %v581_v33 }
 0x140   : > { %v434_v38 = vadd.f32 %v903_v34, %v433_v37  ;;  %v489_v37 = vld [vmem:[#allocation3 + $0x8] sm:$0xff] }
 0x142   : > { %v438_v41 = vsel %vm437_vm11, %v903_v34, %v434_v38  ;;  %v576_v34 = vand.u32 4294901760, %v575_v29  ;;  %v588_v38 = vand.u32 4294901760, %v587_v35 }
 0x143   : > { %v1253_v43 = vsel %vm440_vm12, %v442_v42, %v438_v41 }
 0x144   : > { %v450_v48 = vmul.f32 %v448_v47, %v1253_v43  ;;  %577 = vmatpush.msrb.mxu3 %v576_v34 }
 0x146   : > { %583 = vmatpush.msrb.mxu3 %v582_v36 }
 0x148   : > { %589 = vmatpush.msrb.mxu3 %v588_v38 }
 0x14a   : > { %718 = vmatpush.msra.mxu3 %v1263_v55 }
 0x14c   : > { %720 = vmatpush.msra.mxu3 %v1265_v56 }
 0x14e   : > { %722 = vmatpush.msra.mxu3 %v1267_v57 }
 0x150   : > { %724 = vmatpush.msra.mxu3 %v1269_v61 }
 0x152   : > { %726 = vmatpush.msra.mxu3 %v1271_v62 }
 0x154   : > { %728 = vmatpush.msra.mxu3 %v1273_v63 }
 0x156   : > { %730 = vmatpush.msra.mxu3 %v1286_v5 }
 0x158   : > { %732 = vmatpush.msra.mxu3 %v1302_v12 }
 0x1a1   : > { %v453_v44 = vpop.permute.xlu0 %452 }
 0x1a2   : > { %v455_v45 = vmul.f32 %v453_v44, %v1253_v43 }
 0x1a4   : > { %457 = vrot.lane.b32.xlu1 %v455_v45, %s1095_s4 }
 0x1a9   : > { %v492_v39 = vpop.permute.xlu0 %491 }
 0x216   : > { %v458_v49 = vpop.permute.xlu1 %457 }
 0x217   : > { %v1259_v50 = vadd.f32 %v458_v49, %v450_v48 }
 0x219   : > { %904 = vtanh.f32 %v1259_v50 }
 0x21f   : > { %v905_v51 = vpop.eup %904 }
 0x220   : > { %463 = vrot.lane.b32.xlu2 %v905_v51, %s1096_s28 }
 0x27a   : > { %v464_v27 = vpop.permute.xlu2 %463 }
 0x27b   : > { %v466_v31 = vmul.f32 %v464_v27, %v1253_v43 }
 0x27d   : > { %468 = vrot.lane.b32.xlu2 %v466_v31, %s1095_s4 }
 0x285   : > { %759 = vrot.lane.b32.xlu2 %v489_v37, %s1095_s4 }
 0x28d   : > { %473 = vrot.lane.b32.xlu2 %v1259_v50, %s1097_s29  ;;  %v897_v50 = vld [vmem:[%s1397_s5] ss:$0 sm:$0xff]  ;;  %s804_s5 = sshll.u32 (%p95_p0), %s1099_s3, 4  ;;  %s805_s5 = int_to_ptr.vmem [resolvable:$true] %s804_s5 }
 0x2d7   : > { %v469_v40 = vpop.permute.xlu2 %468 }
 0x2d8   : > { %471 = vst.msk [vmem:[#allocation2] sm:$0xff] %vm88_vm0, %v469_v40  ;;  %v494_v41 = vsel %vm88_vm0, %v469_v40, %v492_v39 }
 0x2d9   : > { %v499_v42 = vsel %vm185_vm8, %v494_v41, 0 }
 0x2da   : > { %v525_v43 = vand.u32 4294901760, %v499_v42 }
 0x2dc   : > { %v526_v44 = vsub.f32 %v499_v42, %v525_v43  ;;  %591 = vmatmul.f32.vlgmr.msrb.gmra.mxu3 %v525_v43 }
 0x2de   : > { %629 = vmatmul.f32.vlgmr.msra.gmra.mxu0 %v526_v44  ;;  %v527_v45 = vand.u32 4294901760, %v526_v44 }
 0x2df   : > { %v760_v46 = vpop.permute.xlu2 %759  ;;  %v792_v23 = vld [vmem:[#allocation2] sm:$0xff] (%p95_p0) }
 0x2e0   : > { %660 = vmatmul.f32.vlgmr.msra.gmra.mxu1 %v527_v45  ;;  %v528_v47 = vsub.f32 %v526_v44, %v527_v45  ;;  %794 = vst.msk [vmem:[#allocation13] sm:$0xff] (%p95_p0), %vm88_vm0, %v792_v23 }
 0x2e2   : > { %v529_v48 = vand.u32 4294901760, %v528_v47 }
 0x2e4   : > { %530 = vmatmul.f32.vlgmr.msrb.gmra.mxu2 %v529_v48  ;;  %734 = vmatmul.f32.vlgmr.msra.gmra.mxu3 %v525_v43 }
 0x2e7   : > { %v474_v49 = vpop.permute.xlu2 %473 }
 0x2e8   : > { %476 = vst.msk [vmem:[#allocation3] sm:$0xff] %vm88_vm0, %v474_v49 }
 0x2ec   : > { %705 = vmatmul.f32.vlgmr.msra.gmra.mxu2 %v525_v43 }
 0x2ef   :  { %v796_v25 = vld [vmem:[#allocation3] sm:$0xff] (%p95_p0) }
 0x2f0   :  { %798 = vst.msk [vmem:[#allocation15] sm:$0xff] (%p95_p0), %vm88_vm0, %v796_v25 }
 0x35b   : > { %v630_v55 = vpop.f32.mrf.mxu0 }
 0x35d   : > { %v661_v57 = vpop.f32.mrf.mxu1 }
 0x35f   : > { %v592_v51 = vpop.f32.mrf.mxu3 }
 0x367   : > { %v531_v52 = vpop.f32.mrf.mxu2  ;;  %v735_v61 = vpop.f32.mrf.mxu3 }
 0x368   : > { %v532_v53 = vadd.f32 %v897_v50, %v531_v52 }
 0x36a   : > { %v593_v54 = vadd.f32 %v592_v51, %v532_v53 }
 0x36c   : > { %v631_v56 = vadd.f32 %v630_v55, %v593_v54 }
 0x36e   : > { %v662_v58 = vadd.f32 %v661_v57, %v631_v56 }
 0x36f   : > { %v706_v59 = vpop.f32.mrf.mxu2 }
 0x370   : > { %v707_v60 = vadd.f32 %v706_v59, %v662_v58 }
 0x372   : > { %v736_v62 = vadd.f32 %v735_v61, %v707_v60 }
 0x374   : > { %906 = vtanh.f32 %v736_v62  ;;  %v873_v0 = vmul.f32 -1.442695, %v736_v62 }
 0x376   : > { %908 = vpow2.f32 %v873_v0 }
 0x37a   : > { %v907_v63 = vpop.eup %906 }
 0x37b   : > { %764 = vrot.lane.b32.xlu1 %v907_v63, %s1096_s28 }
 0x37c   : > { %v909_v1 = vpop.eup %908 }
 0x37d   : > { %v741_v2 = vadd.f32 1.0, %v909_v1 }
 0x37f   : > { %910 = vrcp.f32 %v741_v2  ;;  %v753_v8 = vand.u32 2147483648, %v741_v2  ;;  %vm747_vm14 = vweird.f32 %v741_v2  ;;  %v751_v9 = vand.u32 2147483647, %v741_v2 }
 0x381   : > { %v754_v11 = vor.u32 1.1754944e-38, %v753_v8  ;;  %vm752_vm1 = vcmp.eq.f32.partialorder %v751_v9, 8.507059e+37 }
 0x385   : > { %v911_v3 = vpop.eup %910 }
 0x386   : > { %v743_v4 = vmul.f32 %v911_v3, %v741_v2  ;;  %vm748_vm13 = vweird.f32 %v911_v3 }
 0x387   : > { %vm749_vm15 = vmor %vm747_vm14, %vm748_vm13 }
 0x388   : > { %v744_v5 = vsub.f32 1.0, %v743_v4 }
 0x38a   : > { %v745_v6 = vmul.f32 %v911_v3, %v744_v5 }
 0x38c   : > { %v746_v7 = vadd.f32 %v911_v3, %v745_v6 }
 0x38e   : > { %v750_v10 = vsel %vm749_vm15, %v911_v3, %v746_v7 }
 0x38f   : > { %v755_v13 = vsel %vm752_vm1, %v754_v11, %v750_v10 }
 0x390   : > { %v762_v15 = vmul.f32 %v760_v46, %v755_v13 }
 0x3ed   : > { %v765_v12 = vpop.permute.xlu1 %764 }
 0x3ee   : > { %v767_v14 = vmul.f32 %v765_v12, %v755_v13 }
 0x3f0   : > { %769 = vrot.lane.b32.xlu0 %v767_v14, %s1095_s4 }
 0x462   : > { %v770_v16 = vpop.permute.xlu0 %769 }
 0x463   : > { %v772_v17 = vadd.f32 %v770_v16, %v762_v15 }
 0x465   : > { %912 = vtanh.f32 %v772_v17 }
 0x46b   : > { %v913_v18 = vpop.eup %912 }
 0x46c   : > { %775 = vrot.lane.b32.xlu1 %v913_v18, %s1096_s28 }
 0x474   : > { %785 = vrot.lane.b32.xlu1 %v772_v17, %s1097_s29 }
 0x4de   : > { %v776_v19 = vpop.permute.xlu1 %775 }
 0x4df   : > { %v778_v20 = vmul.f32 %v776_v19, %v755_v13 }
 0x4e1   : > { %780 = vrot.lane.b32.xlu0 %v778_v20, %s1095_s4 }
 0x4e6   : > { %v786_v21 = vpop.permute.xlu1 %785 }
 0x4e7   : > { %788 = vst.msk [vmem:[#allocation3 + $0x8] sm:$0xff] %vm88_vm0, %v786_v21 }
 0x4ee   :  { %v797_v26 = vld [vmem:[#allocation3 + $0x8] sm:$0xff] (%p95_p0) }
 0x4ef   :  { %799 = vst.msk [vmem:[#allocation15 + $0x8] sm:$0xff] (%p95_p0), %vm88_vm0, %v797_v26 }
 0x551   :  { %97 = sbr.rel (!%p95_p0) target bundleno = 27 (0x1b), region = 94 }
 0x553   : > { %v781_v22 = vpop.permute.xlu0 %780 }
 0x554   : > { %783 = vst.msk [vmem:[#allocation2 + $0x8] sm:$0xff] %vm88_vm0, %v781_v22 }
 0x555   : > { %791 = vst.msk [vmem:[%s790_s11] sm:$0xff] %vm88_vm0, %v781_v22 }
 0x556   :  { %812 = dma.vmem_to_hbm [thread:$0]  %s805_s5, 1024, %s807_s2, [#allocation6], %s1089_s13, %s1089_s13, %s1090_s14  }
 0x55b   :  { %v793_v24 = vld [vmem:[#allocation2 + $0x8] sm:$0xff] }
 0x55c   :  { %795 = vst.msk [vmem:[#allocation13 + $0x8] sm:$0xff] %vm88_vm0, %v793_v24 }
 0x55d   :  { %825 = dma.vmem_to_hbm [thread:$0]  %s818_s17, 256, %s820_s15, [#allocation14], %s1089_s13, %s1089_s13, %s1090_s14  }
 0x55e   :  { %838 = dma.vmem_to_hbm [thread:$0]  %s831_s0, 256, %s833_s20, [#allocation14], %s1089_s13, %s1089_s13, %s1090_s14  }
 0x55f   :  { %1080 = dma.done.wait [#allocation6], 1024  }
 0x560   :  { %1081 = vsyncadd [#allocation6], 4294966272 }
 0x561   :  { %1082 = dma.done.wait [#allocation14], 512  }
 0x562   :  { %1083 = vsyncadd [#allocation14], 4294966784 }
 0x563   :  { %851 = vsyncpa [#allocation5], 1 }
 0x564   :  { %852 = vsyncpa [#allocation10], 1 }
 0x565   :  { %853 = vsyncpa [#allocation6], 1 }
 0x566   :  { %854 = vsyncpa [#allocation14], 1 }
 0x567   :  { %855 = vsyncpa [#allocation7], 1 }

</bundles_post_ra>
